<compile_context>
chip_gen: v5e
topology: v5e:2x2
jax: 0.10.0
libtpu: 0.0.40
codegen_flags: <defaults>
</compile_context>

<pallas_src>
import math
from functools import partial

import jax
import jax.numpy as jnp
from jax.experimental import pallas as pl
from jax.experimental.pallas import tpu as pltpu


# ---------------------------------------------------------------------------
# Kernel.  Grid = (batch n, q row-tile qt, ffn hidden-tile ht)
# ---------------------------------------------------------------------------
def transformer_block_kernel(
    v_ref, q_ref,
    g1_ref, be1_ref, g2_ref, be2_ref,
    wvo_ref, beff_ref,
    wf1_ref, bf1_ref, wf2_ref, bf2_ref,
    out_ref,
    attn_sc, x_sc, xn_sc, acc_sc,
    *, matmul_dtype):
    ht = pl.program_id(2)
    eps = jnp.float32(1e-5)

    def layernorm(x, g_ref, b_ref):
        # single-pass LN: mean and mean-of-squares from one sweep over the row
        mu = jnp.mean(x, axis=-1, keepdims=True)
        msq = jnp.mean(x * x, axis=-1, keepdims=True)
        var = jnp.maximum(msq - mu * mu, 0.0)
        return (x - mu) * jax.lax.rsqrt(var + eps) * g_ref[...] + b_ref[...]

    @pl.when(ht == 0)
    def _prologue():
        # ----- attention branch (factorized; Q/K/mask provably unused) -----
        vn = layernorm(v_ref[0].astype(jnp.float32), g1_ref, be1_ref)  # (Lv,E)
        vsum = jnp.sum(vn, axis=0, keepdims=True)                      # (1,E)
        attn_row = jnp.dot(vsum.astype(matmul_dtype), wvo_ref[...],
                           preferred_element_type=jnp.float32) + beff_ref[...]
        attn_sc[...] = attn_row
        # ----- residual + norm2, cached across hidden tiles -----
        x = q_ref[0].astype(jnp.float32) + attn_row      # row broadcast (TQ,E)
        x_sc[...] = x
        xn_sc[...] = layernorm(x, g2_ref, be2_ref).astype(matmul_dtype)
        acc_sc[...] = jnp.zeros_like(acc_sc)

    # ----- feed-forward: one hidden tile per grid step, f32 accumulation ----
    h1 = jnp.maximum(
        jnp.dot(xn_sc[...], wf1_ref[...], preferred_element_type=jnp.float32)
        + bf1_ref[...], 0.0).astype(matmul_dtype)        # bf16 right after ReLU
    acc_sc[...] += jnp.dot(h1, wf2_ref[...], preferred_element_type=jnp.float32)

    @pl.when(ht == pl.num_programs(2) - 1)
    def _epilogue():
        out_ref[0] = x_sc[...] + acc_sc[...] + bf2_ref[...]


# ---------------------------------------------------------------------------
# Host-side weight preparation (call once; keeps transpose/cast/fusion out of
# the hot path).
# ---------------------------------------------------------------------------
def prepare_params(params, v_len, *, matmul_dtype=jnp.bfloat16):
    f32 = jnp.float32

    def t(w):
        return jnp.asarray(w, f32).T.astype(matmul_dtype)      # (in, out)

    def row(b):
        return jnp.asarray(b, f32).reshape(1, -1)

    w_v = jnp.asarray(params["w_v"], f32)
    w_o = jnp.asarray(params["w_o"], f32)
    b_v = jnp.asarray(params["b_v"], f32)
    b_o = jnp.asarray(params["b_o"], f32)
    # x @ W_v^T @ W_o^T == x @ (W_v^T @ W_o^T);  sum_v bias term absorbed here.
    w_vo = (w_v.T @ w_o.T).astype(matmul_dtype)                 # (E, E)
    b_eff = (jnp.float32(v_len) * b_v) @ w_o.T + b_o            # (E,)
    return dict(
        w_vo=w_vo, b_eff=b_eff.reshape(1, -1),
        g1=row(params["g1"]), beta1=row(params["beta1"]),
        g2=row(params["g2"]), beta2=row(params["beta2"]),
        w_ff1=t(params["w_ff1"]), b_ff1=row(params["b_ff1"]),
        w_ff2=t(params["w_ff2"]), b_ff2=row(params["b_ff2"]),
    )


def _pick_tile(dim, max_tile, align):
    if dim <= max_tile:
        return dim
    t = (max_tile // align) * align
    while t >= align:
        if dim % t == 0:
            return t
        t -= align
    return dim


# ---------------------------------------------------------------------------
# Runner
# ---------------------------------------------------------------------------
def run_transformer_block(value, key_, query, mask, prepared, heads, *,
                          matmul_dtype=jnp.bfloat16,
                          max_tile_q=256, max_tile_h=2048,
                          vmem_limit_bytes=48 * 1024 * 1024):
    N, Lq, E = query.shape
    Lv = value.shape[1]
    assert E % heads == 0
    # `key_` and `mask` provably do not affect the output of the reference
    # einsum, so they are never DMA'd into the kernel.
    del key_, mask

    H = prepared["w_ff1"].shape[1]
    f32_mm = jnp.dtype(matmul_dtype) == jnp.dtype(jnp.float32)
    act_dtype = jnp.float32 if f32_mm else jnp.dtype(matmul_dtype)

    TQ = _pick_tile(Lq, max_tile_q, 8)
    TH = _pick_tile(H, max_tile_h, 128)
    grid = (N, Lq // TQ, H // TH)

    v3d = value.astype(act_dtype)
    q3d = query.astype(act_dtype)

    const2d = lambda n, qt, ht: (0, 0)
    in_specs = [
        pl.BlockSpec((1, Lv, E), lambda n, qt, ht: (n, 0, 0)),   # value
        pl.BlockSpec((1, TQ, E), lambda n, qt, ht: (n, qt, 0)),  # query
        pl.BlockSpec((1, E), const2d),                           # gamma1
        pl.BlockSpec((1, E), const2d),                           # beta1
        pl.BlockSpec((1, E), const2d),                           # gamma2
        pl.BlockSpec((1, E), const2d),                           # beta2
        pl.BlockSpec((E, E), const2d),                           # fused W_vo
        pl.BlockSpec((1, E), const2d),                           # fused b_eff
        pl.BlockSpec((E, TH), lambda n, qt, ht: (0, ht)),        # W_ff1
        pl.BlockSpec((1, TH), lambda n, qt, ht: (0, ht)),        # b_ff1
        pl.BlockSpec((TH, E), lambda n, qt, ht: (ht, 0)),        # W_ff2
        pl.BlockSpec((1, E), const2d),                           # b_ff2
    ]
    out_specs = pl.BlockSpec((1, TQ, E), lambda n, qt, ht: (n, qt, 0))

    args = [v3d, q3d,
            prepared["g1"], prepared["beta1"],
            prepared["g2"], prepared["beta2"],
            prepared["w_vo"], prepared["b_eff"],
            prepared["w_ff1"], prepared["b_ff1"],
            prepared["w_ff2"], prepared["b_ff2"]]

    M = N * Lq
    act_b = jnp.dtype(act_dtype).itemsize
    mm_b = jnp.dtype(matmul_dtype).itemsize
    cost = pl.CostEstimate(
        flops=4 * M * E * H + 2 * N * E * E,
        transcendentals=M + N * Lv,          # one rsqrt per LayerNorm row
        bytes_accessed=(N * Lv * E + M * E) * act_b
                       + (E * E + 2 * E * H) * mm_b
                       + M * E * 4)

    kernel = partial(transformer_block_kernel, matmul_dtype=matmul_dtype)

    out3d = pl.pallas_call(
        kernel,
        out_shape=jax.ShapeDtypeStruct((N, Lq, E), jnp.float32),
        grid=grid,
        in_specs=in_specs,
        out_specs=out_specs,
        scratch_shapes=[
            pltpu.VMEM((1, E), jnp.float32),     # attn_row
            pltpu.VMEM((TQ, E), jnp.float32),    # x (residual)
            pltpu.VMEM((TQ, E), matmul_dtype),   # norm2(x), matmul LHS
            pltpu.VMEM((TQ, E), jnp.float32),    # FFN accumulator
        ],
        compiler_params=pltpu.CompilerParams(
            dimension_semantics=("parallel", "parallel", "arbitrary"),
            vmem_limit_bytes=vmem_limit_bytes),
        cost_estimate=cost,
    )(*args)
    return out3d


# ---------------------------------------------------------------------------
# Pure-JAX f32 mirror of the PyTorch forward (dropout = identity)
# ---------------------------------------------------------------------------
def ref_forward(value, key_, query, mask3, p, heads):
    N, Lq, E = query.shape
    Lv, Lk = value.shape[1], key_.shape[1]
    D = E // heads

    def ln(x, g, b):
        mu = x.mean(-1, keepdims=True)
        var = ((x - mu) ** 2).mean(-1, keepdims=True)
        return (x - mu) / jnp.sqrt(var + 1e-5) * g + b

    def lin(x, w, b):
        return x @ w.T + b

    vn = ln(value, p["g1"], p["beta1"])
    kn = ln(key_, p["g1"], p["beta1"])
    qn = ln(query, p["g1"], p["beta1"])
    v_p = lin(vn, p["w_v"], p["b_v"]).reshape(N, Lv, heads, D)
    k_p = lin(kn, p["w_k"], p["b_k"]).reshape(N, Lk, heads, D)
    q_p = lin(qn, p["w_q"], p["b_q"]).reshape(N, Lq, heads, D)
    energy = jnp.einsum('nqhd,nkhd->nhqk', q_p, k_p)
    energy = jnp.where(mask3[:, None, :, :] == 0, jnp.float32(-1e20), energy)
    attn = jax.nn.softmax(energy / math.sqrt(D), axis=3)
    out = jnp.einsum('nhqk,nvhd->nqhd', attn, v_p)
    out = lin(out.reshape(N, Lq, E), p["w_o"], p["b_o"])
    x = query + out
    xn = ln(x, p["g2"], p["beta2"])
    ff = lin(jnp.maximum(lin(xn, p["w_ff1"], p["b_ff1"]), 0.0),
             p["w_ff2"], p["b_ff2"])
    return x + ff


def init_params(key, embed_size, forward_expansion):
    hidden = forward_expansion * embed_size
    ks = jax.random.split(key, 6)

    def lin_init(k, din, dout):
        bound = 1.0 / math.sqrt(din)
        kw, kb = jax.random.split(k)
        w = jax.random.uniform(kw, (dout, din), jnp.float32, -bound, bound)
        b = jax.random.uniform(kb, (dout,), jnp.float32, -bound, bound)
        return w, b

    w_v, b_v = lin_init(ks[0], embed_size, embed_size)
    w_k, b_k = lin_init(ks[1], embed_size, embed_size)
    w_q, b_q = lin_init(ks[2], embed_size, embed_size)
    w_o, b_o = lin_init(ks[3], embed_size, embed_size)
    w_ff1, b_ff1 = lin_init(ks[4], embed_size, hidden)
    w_ff2, b_ff2 = lin_init(ks[5], hidden, embed_size)
    return dict(
        w_v=w_v, b_v=b_v, w_k=w_k, b_k=b_k, w_q=w_q, b_q=b_q,
        w_o=w_o, b_o=b_o,
        g1=jnp.ones((embed_size,), jnp.float32),
        beta1=jnp.zeros((embed_size,), jnp.float32),
        g2=jnp.ones((embed_size,), jnp.float32),
        beta2=jnp.zeros((embed_size,), jnp.float32),
        w_ff1=w_ff1, b_ff1=b_ff1, w_ff2=w_ff2, b_ff2=b_ff2,
    )


if __name__ == "__main__":
    N, L, E = 2, 8, 32
    heads = 4
    forward_expansion = 4

    root = jax.random.PRNGKey(0)
    k_params, k_v, k_k, k_q = jax.random.split(root, 4)

    params = init_params(k_params, E, forward_expansion)
    value = jax.random.normal(k_v, (N, L, E), jnp.float32)
    key_ = jax.random.normal(k_k, (N, L, E), jnp.float32)
    query = jax.random.normal(k_q, (N, L, E), jnp.float32)
    # causal-style mask (provably has no effect under the reference einsum)
    mask3 = (jnp.arange(L)[None, :, None] >= jnp.arange(L)[None, None, :])
    mask3 = jnp.broadcast_to(mask3, (N, L, L)).astype(jnp.int32)

    ref = jax.block_until_ready(
        ref_forward(value, key_, query, mask3, params, heads))

    # exact-semantics check: all-f32 activations and matmuls
    prep_f32 = prepare_params(params, L, matmul_dtype=jnp.float32)
    out_f32 = jax.block_until_ready(
        run_transformer_block(value, key_, query, mask3, prep_f32, heads,
                              matmul_dtype=jnp.float32))
    assert out_f32.shape == (N, L, E)
    assert float(jnp.max(jnp.abs(out_f32 - ref))) < 3e-3

    # performance configuration: bf16 activation DMA + bf16 MXU operands,
    # f32 accumulation / LN / residual math
    prep_bf16 = prepare_params(params, L, matmul_dtype=jnp.bfloat16)
    out = jax.block_until_ready(
        run_transformer_block(value, key_, query, mask3, prep_bf16, heads,
                              matmul_dtype=jnp.bfloat16))
    assert out.shape == (N, L, E)
    assert float(jnp.max(jnp.abs(out - ref))) < 1.5e-1

    print("KERNEL_OK")
</pallas_src>

<mosaic_0001>
module attributes {stable_mosaic.version = 11 : i64} {
  func.func @transformer_block_kernel(%arg0: i32, %arg1: i32, %arg2: i32, %arg3: memref<1x8x32xf32, #tpu.memory_space<vmem>>, %arg4: memref<1x8x32xf32, #tpu.memory_space<vmem>>, %arg5: memref<1x32xf32, #tpu.memory_space<vmem>>, %arg6: memref<1x32xf32, #tpu.memory_space<vmem>>, %arg7: memref<1x32xf32, #tpu.memory_space<vmem>>, %arg8: memref<1x32xf32, #tpu.memory_space<vmem>>, %arg9: memref<32x32xf32, #tpu.memory_space<vmem>>, %arg10: memref<1x32xf32, #tpu.memory_space<vmem>>, %arg11: memref<32x128xf32, #tpu.memory_space<vmem>>, %arg12: memref<1x128xf32, #tpu.memory_space<vmem>>, %arg13: memref<128x32xf32, #tpu.memory_space<vmem>>, %arg14: memref<1x32xf32, #tpu.memory_space<vmem>>, %arg15: memref<1x8x32xf32, #tpu.memory_space<vmem>>, %arg16: memref<1x32xf32, #tpu.memory_space<vmem>>, %arg17: memref<8x32xf32, #tpu.memory_space<vmem>>, %arg18: memref<8x32xf32, #tpu.memory_space<vmem>>, %arg19: memref<8x32xf32, #tpu.memory_space<vmem>>) attributes {dimension_semantics = [#tpu.dimension_semantics<parallel>, #tpu.dimension_semantics<parallel>, #tpu.dimension_semantics<arbitrary>], iteration_bounds = array<i64: 2, 1, 1>, scalar_prefetch = 0 : i64, scratch_operands = 4 : i64, tpu.core_type = #tpu.core_type<tc>, window_params = [{transform_indices = @transform_0, window_bounds = array<i64: 1, 8, 32>}, {transform_indices = @transform_1, window_bounds = array<i64: 1, 8, 32>}, {pipeline_mode = #tpu.pipeline_mode<synchronous>, transform_indices = @transform_2, window_bounds = array<i64: 1, 32>}, {pipeline_mode = #tpu.pipeline_mode<synchronous>, transform_indices = @transform_3, window_bounds = array<i64: 1, 32>}, {pipeline_mode = #tpu.pipeline_mode<synchronous>, transform_indices = @transform_4, window_bounds = array<i64: 1, 32>}, {pipeline_mode = #tpu.pipeline_mode<synchronous>, transform_indices = @transform_5, window_bounds = array<i64: 1, 32>}, {pipeline_mode = #tpu.pipeline_mode<synchronous>, transform_indices = @transform_6, window_bounds = array<i64: 32, 32>}, {pipeline_mode = #tpu.pipeline_mode<synchronous>, transform_indices = @transform_7, window_bounds = array<i64: 1, 32>}, {transform_indices = @transform_8, window_bounds = array<i64: 32, 128>}, {transform_indices = @transform_9, window_bounds = array<i64: 1, 128>}, {transform_indices = @transform_10, window_bounds = array<i64: 128, 32>}, {pipeline_mode = #tpu.pipeline_mode<synchronous>, transform_indices = @transform_11, window_bounds = array<i64: 1, 32>}, {transform_indices = @transform_12, window_bounds = array<i64: 1, 8, 32>}]} {
    %c0_i32 = arith.constant 0 : i32
    %0 = arith.cmpi eq, %arg2, %c0_i32 : i32
    %1 = arith.extui %0 : i1 to i32
    %cst = arith.constant 9.99999974E-6 : f32
    %c0_i32_0 = arith.constant 0 : i32
    %2 = arith.cmpi ne, %1, %c0_i32_0 : i32
    scf.if %2 {
      %c0_17 = arith.constant 0 : index
      %c0_18 = arith.constant 0 : index
      %c0_19 = arith.constant 0 : index
      %19 = vector.load %arg3[%c0_17, %c0_18, %c0_19] : memref<1x8x32xf32, #tpu.memory_space<vmem>>, vector<1x8x32xf32>
      %20 = vector.shape_cast %19 : vector<1x8x32xf32> to vector<8x32xf32>
      %cst_20 = arith.constant dense<0.000000e+00> : vector<8xf32>
      %21 = vector.multi_reduction <add>, %20, %cst_20 [1] : vector<8x32xf32> to vector<8xf32>
      %22 = vector.shape_cast %21 : vector<8xf32> to vector<8x1xf32>
      %cst_21 = arith.constant 3.200000e+01 : f32
      %23 = vector.broadcast %cst_21 : f32 to vector<8x1xf32>
      %24 = arith.divf %22, %23 : vector<8x1xf32>
      %25 = arith.mulf %20, %20 : vector<8x32xf32>
      %cst_22 = arith.constant dense<0.000000e+00> : vector<8xf32>
      %26 = vector.multi_reduction <add>, %25, %cst_22 [1] : vector<8x32xf32> to vector<8xf32>
      %27 = vector.shape_cast %26 : vector<8xf32> to vector<8x1xf32>
      %cst_23 = arith.constant 3.200000e+01 : f32
      %28 = vector.broadcast %cst_23 : f32 to vector<8x1xf32>
      %29 = arith.divf %27, %28 : vector<8x1xf32>
      %30 = arith.mulf %24, %24 : vector<8x1xf32>
      %31 = arith.subf %29, %30 : vector<8x1xf32>
      %cst_24 = arith.constant 0.000000e+00 : f32
      %32 = vector.broadcast %cst_24 : f32 to vector<8x1xf32>
      %33 = arith.maximumf %31, %32 : vector<8x1xf32>
      %34 = vector.broadcast %24 : vector<8x1xf32> to vector<8x32xf32>
      %35 = arith.subf %20, %34 : vector<8x32xf32>
      %36 = vector.broadcast %cst : f32 to vector<8x1xf32>
      %37 = arith.addf %33, %36 : vector<8x1xf32>
      %38 = math.rsqrt %37 : vector<8x1xf32>
      %39 = vector.broadcast %38 : vector<8x1xf32> to vector<8x32xf32>
      %40 = arith.mulf %35, %39 : vector<8x32xf32>
      %c0_25 = arith.constant 0 : index
      %c0_26 = arith.constant 0 : index
      %41 = vector.load %arg5[%c0_25, %c0_26] : memref<1x32xf32, #tpu.memory_space<vmem>>, vector<1x32xf32>
      %42 = vector.broadcast %41 : vector<1x32xf32> to vector<8x32xf32>
      %43 = arith.mulf %40, %42 : vector<8x32xf32>
      %c0_27 = arith.constant 0 : index
      %c0_28 = arith.constant 0 : index
      %44 = vector.load %arg6[%c0_27, %c0_28] : memref<1x32xf32, #tpu.memory_space<vmem>>, vector<1x32xf32>
      %45 = vector.broadcast %44 : vector<1x32xf32> to vector<8x32xf32>
      %46 = arith.addf %43, %45 : vector<8x32xf32>
      %cst_29 = arith.constant dense<0.000000e+00> : vector<32xf32>
      %47 = vector.multi_reduction <add>, %46, %cst_29 [0] : vector<8x32xf32> to vector<32xf32>
      %48 = vector.shape_cast %47 : vector<32xf32> to vector<1x32xf32>
      %c0_30 = arith.constant 0 : index
      %c0_31 = arith.constant 0 : index
      %49 = vector.load %arg9[%c0_30, %c0_31] : memref<32x32xf32, #tpu.memory_space<vmem>>, vector<32x32xf32>
      %cst_32 = arith.constant dense<0.000000e+00> : vector<1x32xf32>
      %50 = tpu.matmul %48, %49, %cst_32 {dimension_numbers = #tpu.dot_dimension_numbers<[1], [0], [0], [1], [0, 0, 1, 1], [], []>} : vector<1x32xf32>, vector<32x32xf32>, vector<1x32xf32> -> vector<1x32xf32>
      %c0_33 = arith.constant 0 : index
      %c0_34 = arith.constant 0 : index
      %51 = vector.load %arg10[%c0_33, %c0_34] : memref<1x32xf32, #tpu.memory_space<vmem>>, vector<1x32xf32>
      %52 = arith.addf %50, %51 : vector<1x32xf32>
      %c0_35 = arith.constant 0 : index
      %c0_36 = arith.constant 0 : index
      %53 = vector.load %arg16[%c0_35, %c0_36] : memref<1x32xf32, #tpu.memory_space<vmem>>, vector<1x32xf32>
      tpu.vector_store %arg16[%c0_35, %c0_36], %52 {strides = array<i32>} : memref<1x32xf32, #tpu.memory_space<vmem>>, vector<1x32xf32>,
      %c0_37 = arith.constant 0 : index
      %c0_38 = arith.constant 0 : index
      %c0_39 = arith.constant 0 : index
      %54 = vector.load %arg4[%c0_37, %c0_38, %c0_39] : memref<1x8x32xf32, #tpu.memory_space<vmem>>, vector<1x8x32xf32>
      %55 = vector.shape_cast %54 : vector<1x8x32xf32> to vector<8x32xf32>
      %56 = vector.broadcast %52 : vector<1x32xf32> to vector<8x32xf32>
      %57 = arith.addf %55, %56 : vector<8x32xf32>
      %c0_40 = arith.constant 0 : index
      %c0_41 = arith.constant 0 : index
      %58 = vector.load %arg17[%c0_40, %c0_41] : memref<8x32xf32, #tpu.memory_space<vmem>>, vector<8x32xf32>
      tpu.vector_store %arg17[%c0_40, %c0_41], %57 {strides = array<i32>} : memref<8x32xf32, #tpu.memory_space<vmem>>, vector<8x32xf32>,
      %cst_42 = arith.constant dense<0.000000e+00> : vector<8xf32>
      %59 = vector.multi_reduction <add>, %57, %cst_42 [1] : vector<8x32xf32> to vector<8xf32>
      %60 = vector.shape_cast %59 : vector<8xf32> to vector<8x1xf32>
      %cst_43 = arith.constant 3.200000e+01 : f32
      %61 = vector.broadcast %cst_43 : f32 to vector<8x1xf32>
      %62 = arith.divf %60, %61 : vector<8x1xf32>
      %63 = arith.mulf %57, %57 : vector<8x32xf32>
      %cst_44 = arith.constant dense<0.000000e+00> : vector<8xf32>
      %64 = vector.multi_reduction <add>, %63, %cst_44 [1] : vector<8x32xf32> to vector<8xf32>
      %65 = vector.shape_cast %64 : vector<8xf32> to vector<8x1xf32>
      %cst_45 = arith.constant 3.200000e+01 : f32
      %66 = vector.broadcast %cst_45 : f32 to vector<8x1xf32>
      %67 = arith.divf %65, %66 : vector<8x1xf32>
      %68 = arith.mulf %62, %62 : vector<8x1xf32>
      %69 = arith.subf %67, %68 : vector<8x1xf32>
      %cst_46 = arith.constant 0.000000e+00 : f32
      %70 = vector.broadcast %cst_46 : f32 to vector<8x1xf32>
      %71 = arith.maximumf %69, %70 : vector<8x1xf32>
      %72 = vector.broadcast %62 : vector<8x1xf32> to vector<8x32xf32>
      %73 = arith.subf %57, %72 : vector<8x32xf32>
      %74 = vector.broadcast %cst : f32 to vector<8x1xf32>
      %75 = arith.addf %71, %74 : vector<8x1xf32>
      %76 = math.rsqrt %75 : vector<8x1xf32>
      %77 = vector.broadcast %76 : vector<8x1xf32> to vector<8x32xf32>
      %78 = arith.mulf %73, %77 : vector<8x32xf32>
      %c0_47 = arith.constant 0 : index
      %c0_48 = arith.constant 0 : index
      %79 = vector.load %arg7[%c0_47, %c0_48] : memref<1x32xf32, #tpu.memory_space<vmem>>, vector<1x32xf32>
      %80 = vector.broadcast %79 : vector<1x32xf32> to vector<8x32xf32>
      %81 = arith.mulf %78, %80 : vector<8x32xf32>
      %c0_49 = arith.constant 0 : index
      %c0_50 = arith.constant 0 : index
      %82 = vector.load %arg8[%c0_49, %c0_50] : memref<1x32xf32, #tpu.memory_space<vmem>>, vector<1x32xf32>
      %83 = vector.broadcast %82 : vector<1x32xf32> to vector<8x32xf32>
      %84 = arith.addf %81, %83 : vector<8x32xf32>
      %c0_51 = arith.constant 0 : index
      %c0_52 = arith.constant 0 : index
      %85 = vector.load %arg18[%c0_51, %c0_52] : memref<8x32xf32, #tpu.memory_space<vmem>>, vector<8x32xf32>
      tpu.vector_store %arg18[%c0_51, %c0_52], %84 {strides = array<i32>} : memref<8x32xf32, #tpu.memory_space<vmem>>, vector<8x32xf32>,
      %cst_53 = arith.constant 0.000000e+00 : f32
      %86 = vector.broadcast %cst_53 : f32 to vector<8x32xf32>
      %c0_54 = arith.constant 0 : index
      %c0_55 = arith.constant 0 : index
      %87 = vector.load %arg19[%c0_54, %c0_55] : memref<8x32xf32, #tpu.memory_space<vmem>>, vector<8x32xf32>
      tpu.vector_store %arg19[%c0_54, %c0_55], %86 {strides = array<i32>} : memref<8x32xf32, #tpu.memory_space<vmem>>, vector<8x32xf32>,
    } else {
    }
    %c0 = arith.constant 0 : index
    %c0_1 = arith.constant 0 : index
    %3 = vector.load %arg18[%c0, %c0_1] : memref<8x32xf32, #tpu.memory_space<vmem>>, vector<8x32xf32>
    %c0_2 = arith.constant 0 : index
    %c0_3 = arith.constant 0 : index
    %4 = vector.load %arg11[%c0_2, %c0_3] : memref<32x128xf32, #tpu.memory_space<vmem>>, vector<32x128xf32>
    %cst_4 = arith.constant dense<0.000000e+00> : vector<8x128xf32>
    %5 = tpu.matmul %3, %4, %cst_4 {dimension_numbers = #tpu.dot_dimension_numbers<[1], [0], [0], [1], [0, 0, 1, 1], [], []>} : vector<8x32xf32>, vector<32x128xf32>, vector<8x128xf32> -> vector<8x128xf32>
    %c0_5 = arith.constant 0 : index
    %c0_6 = arith.constant 0 : index
    %6 = vector.load %arg12[%c0_5, %c0_6] : memref<1x128xf32, #tpu.memory_space<vmem>>, vector<1x128xf32>
    %7 = vector.broadcast %6 : vector<1x128xf32> to vector<8x128xf32>
    %8 = arith.addf %5, %7 : vector<8x128xf32>
    %cst_7 = arith.constant 0.000000e+00 : f32
    %9 = vector.broadcast %cst_7 : f32 to vector<8x128xf32>
    %10 = arith.maximumf %8, %9 : vector<8x128xf32>
    %c0_8 = arith.constant 0 : index
    %c0_9 = arith.constant 0 : index
    %11 = vector.load %arg19[%c0_8, %c0_9] : memref<8x32xf32, #tpu.memory_space<vmem>>, vector<8x32xf32>
    %c0_10 = arith.constant 0 : index
    %c0_11 = arith.constant 0 : index
    %12 = vector.load %arg13[%c0_10, %c0_11] : memref<128x32xf32, #tpu.memory_space<vmem>>, vector<128x32xf32>
    %cst_12 = arith.constant dense<0.000000e+00> : vector<8x32xf32>
    %13 = tpu.matmul %10, %12, %cst_12 {dimension_numbers = #tpu.dot_dimension_numbers<[1], [0], [0], [1], [0, 0, 1, 1], [], []>} : vector<8x128xf32>, vector<128x32xf32>, vector<8x32xf32> -> vector<8x32xf32>
    %14 = arith.addf %11, %13 : vector<8x32xf32>
    %c0_13 = arith.constant 0 : index
    %c0_14 = arith.constant 0 : index
    %15 = vector.load %arg19[%c0_13, %c0_14] : memref<8x32xf32, #tpu.memory_space<vmem>>, vector<8x32xf32>
    tpu.vector_store %arg19[%c0_13, %c0_14], %14 {strides = array<i32>} : memref<8x32xf32, #tpu.memory_space<vmem>>, vector<8x32xf32>,
    %c0_i32_15 = arith.constant 0 : i32
    %16 = arith.cmpi eq, %arg2, %c0_i32_15 : i32
    %17 = arith.extui %16 : i1 to i32
    %c0_i32_16 = arith.constant 0 : i32
    %18 = arith.cmpi ne, %17, %c0_i32_16 : i32
    scf.if %18 {
      %c0_17 = arith.constant 0 : index
      %c0_18 = arith.constant 0 : index
      %19 = vector.load %arg17[%c0_17, %c0_18] : memref<8x32xf32, #tpu.memory_space<vmem>>, vector<8x32xf32>
      %c0_19 = arith.constant 0 : index
      %c0_20 = arith.constant 0 : index
      %20 = vector.load %arg19[%c0_19, %c0_20] : memref<8x32xf32, #tpu.memory_space<vmem>>, vector<8x32xf32>
      %21 = arith.addf %19, %20 : vector<8x32xf32>
      %c0_21 = arith.constant 0 : index
      %c0_22 = arith.constant 0 : index
      %22 = vector.load %arg14[%c0_21, %c0_22] : memref<1x32xf32, #tpu.memory_space<vmem>>, vector<1x32xf32>
      %23 = vector.broadcast %22 : vector<1x32xf32> to vector<8x32xf32>
      %24 = arith.addf %21, %23 : vector<8x32xf32>
      %c0_23 = arith.constant 0 : index
      %c0_24 = arith.constant 0 : index
      %c0_25 = arith.constant 0 : index
      %25 = vector.load %arg15[%c0_23, %c0_24, %c0_25] : memref<1x8x32xf32, #tpu.memory_space<vmem>>, vector<1x8x32xf32>
      %26 = vector.shape_cast %25 : vector<1x8x32xf32> to vector<8x32xf32>
      %27 = vector.shape_cast %24 : vector<8x32xf32> to vector<1x8x32xf32>
      tpu.vector_store %arg15[%c0_23, %c0_24, %c0_25], %27 {strides = array<i32>} : memref<1x8x32xf32, #tpu.memory_space<vmem>>, vector<1x8x32xf32>,
    } else {
    }
    return
  }
  func.func @transform_0(%arg0: i32, %arg1: i32, %arg2: i32) -> (i32, i32, i32) {
    %c0_i32 = arith.constant 0 : i32
    %c0_i32_0 = arith.constant 0 : i32
    %c0_i32_1 = arith.constant 0 : i32
    return %arg0, %c0_i32, %c0_i32_0 : i32, i32, i32
  }
  func.func @transform_1(%arg0: i32, %arg1: i32, %arg2: i32) -> (i32, i32, i32) {
    %c0_i32 = arith.constant 0 : i32
    %c0_i32_0 = arith.constant 0 : i32
    return %arg0, %arg1, %c0_i32 : i32, i32, i32
  }
  func.func @transform_2(%arg0: i32, %arg1: i32, %arg2: i32) -> (i32, i32) {
    %c0_i32 = arith.constant 0 : i32
    %c0_i32_0 = arith.constant 0 : i32
    %c0_i32_1 = arith.constant 0 : i32
    return %c0_i32, %c0_i32_0 : i32, i32
  }
  func.func @transform_3(%arg0: i32, %arg1: i32, %arg2: i32) -> (i32, i32) {
    %c0_i32 = arith.constant 0 : i32
    %c0_i32_0 = arith.constant 0 : i32
    %c0_i32_1 = arith.constant 0 : i32
    return %c0_i32, %c0_i32_0 : i32, i32
  }
  func.func @transform_4(%arg0: i32, %arg1: i32, %arg2: i32) -> (i32, i32) {
    %c0_i32 = arith.constant 0 : i32
    %c0_i32_0 = arith.constant 0 : i32
    %c0_i32_1 = arith.constant 0 : i32
    return %c0_i32, %c0_i32_0 : i32, i32
  }
  func.func @transform_5(%arg0: i32, %arg1: i32, %arg2: i32) -> (i32, i32) {
    %c0_i32 = arith.constant 0 : i32
    %c0_i32_0 = arith.constant 0 : i32
    %c0_i32_1 = arith.constant 0 : i32
    return %c0_i32, %c0_i32_0 : i32, i32
  }
  func.func @transform_6(%arg0: i32, %arg1: i32, %arg2: i32) -> (i32, i32) {
    %c0_i32 = arith.constant 0 : i32
    %c0_i32_0 = arith.constant 0 : i32
    %c0_i32_1 = arith.constant 0 : i32
    return %c0_i32, %c0_i32_0 : i32, i32
  }
  func.func @transform_7(%arg0: i32, %arg1: i32, %arg2: i32) -> (i32, i32) {
    %c0_i32 = arith.constant 0 : i32
    %c0_i32_0 = arith.constant 0 : i32
    %c0_i32_1 = arith.constant 0 : i32
    return %c0_i32, %c0_i32_0 : i32, i32
  }
  func.func @transform_8(%arg0: i32, %arg1: i32, %arg2: i32) -> (i32, i32) {
    %c0_i32 = arith.constant 0 : i32
    %c0_i32_0 = arith.constant 0 : i32
    return %c0_i32, %arg2 : i32, i32
  }
  func.func @transform_9(%arg0: i32, %arg1: i32, %arg2: i32) -> (i32, i32) {
    %c0_i32 = arith.constant 0 : i32
    %c0_i32_0 = arith.constant 0 : i32
    return %c0_i32, %arg2 : i32, i32
  }
  func.func @transform_10(%arg0: i32, %arg1: i32, %arg2: i32) -> (i32, i32) {
    %c0_i32 = arith.constant 0 : i32
    %c0_i32_0 = arith.constant 0 : i32
    return %arg2, %c0_i32 : i32, i32
  }
  func.func @transform_11(%arg0: i32, %arg1: i32, %arg2: i32) -> (i32, i32) {
    %c0_i32 = arith.constant 0 : i32
    %c0_i32_0 = arith.constant 0 : i32
    %c0_i32_1 = arith.constant 0 : i32
    return %c0_i32, %c0_i32_0 : i32, i32
  }
  func.func @transform_12(%arg0: i32, %arg1: i32, %arg2: i32) -> (i32, i32, i32) {
    %c0_i32 = arith.constant 0 : i32
    %c0_i32_0 = arith.constant 0 : i32
    return %arg0, %arg1, %c0_i32 : i32, i32, i32
  }
}

</mosaic_0001>

<bundles_post_ra>
// kernel: tpu_custom_call.1
= control target key start
LH: loop header
LB: loop body
LE: loop exit
PB: predicated region body
PF: predicated region fallthrough
CT: control target
= control target key end

     0   :  { %s1312_s0 = inlined_call_operand.vmem [shape: f32[2,8,32], index: 0, kind: input, shape index: {}]   ;;  %s1313_s1 = inlined_call_operand.vmem [shape: f32[2,8,32], index: 1, kind: input, shape index: {}]   ;;  %s1314_s2 = inlined_call_operand.vmem [shape: f32[1,32], index: 2, kind: input, shape index: {}]   ;;  %s1315_s3 = inlined_call_operand.vmem [shape: f32[1,32], index: 3, kind: input, shape index: {}]   ;;  %s1316_s4 = inlined_call_operand.vmem [shape: f32[1,32], index: 4, kind: input, shape index: {}]   ;;  %s1317_s5 = inlined_call_operand.vmem [shape: f32[1,32], index: 5, kind: input, shape index: {}]   ;;  %s1318_s6 = inlined_call_operand.vmem [shape: f32[32,32], index: 6, kind: input, shape index: {}]   ;;  %s1319_s7 = inlined_call_operand.vmem [shape: f32[1,32], index: 7, kind: input, shape index: {}]   ;;  %s1320_s8 = inlined_call_operand.vmem [shape: f32[32,128], index: 8, kind: input, shape index: {}]   ;;  %s1321_s9 = inlined_call_operand.vmem [shape: f32[1,128], index: 9, kind: input, shape index: {}]   ;;  %s1322_s10 = inlined_call_operand.vmem [shape: f32[128,32], index: 10, kind: input, shape index: {}]   ;;  %s1323_s11 = inlined_call_operand.vmem [shape: f32[1,32], index: 11, kind: input, shape index: {}]   ;;  %s1324_s12 = inlined_call_operand.hbm [shape: f32[2,8,32], index: 12, kind: output, shape index: {}]  }
   0x1   :  { %1326 = sst [smem:[#allocation9_spill]] %s1312_s0 }
   0x2   :  { %1327 = sst [smem:[#allocation10_spill]] %s1313_s1 }
   0x3   :  { %1328 = sst [smem:[#allocation11_spill]] %s1314_s2 }
   0x4   :  { %1329 = sst [smem:[#allocation12_spill]] %s1315_s3 }
   0x5   :  { %17 = vsyncpa [#allocation7], 0 }
   0x6   :  { %19 = vsyncpa [#allocation7 + $0x1], 0  ;;  %s1100_s21 = smov 0   ;;  %s1102_s22 = smov 0  }
   0x7   :  { %s1104_s23 = smov 0   ;;  %s1106_s24 = smov 0  }
   0x8   :  { %s1108_s25 = smov 0   ;;  %s1110_s26 = smov 0  }
   0x9 LB: > { %s867_s27 = sadd.s32 4294967295, %s1031_s26   ;;  %s868_s28 = sadd.s32 4294967294, %s1031_s26   ;;  %s1031_s26 = sphi %s1110_s26, %s25_s26   ;;  %s1027_s25 = sphi %s1108_s25, %s1341_s25   ;;  %s1023_s24 = sphi %s1106_s24, %s1340_s24   ;;  %s1019_s23 = sphi %s1104_s23, %s1339_s23   ;;  %s1015_s22 = sphi %s1102_s22, %s1338_s22   ;;  %s1011_s21 = sphi %s1100_s21, %s1337_s21  }
   0xa   : > { %s44_s29 = sadd.s32 1, %s1027_s25  ;;  %s332_s30 = sadd.s32 1, %s1019_s23 }
   0xb   : > { %p46_p0 = scmp.ge.s32.totalorder %s44_s29, 2  ;;  %p342_p1 = scmp.ne.s32.totalorder %s1019_s23, %s1015_s22 }
   0xc   : > { %p343_p2 = scmp.eq.s32.totalorder %s867_s27, 1  ;;  %p348_p3 = scmp.ne.s32.totalorder %s1015_s22, %s1011_s21 }
   0xd   : > { %s1343_s29 = smov (%p46_p0, %s44_s29), 0  ;;  %p349_p5 = scmp.eq.s32.totalorder %s868_s28, 1 }
   0xe   : > { %p1140_p4 = por %p343_p2, %p342_p1  ;;  %s327_s14 = ssub.s32 %s1027_s25, %s1343_s29 }
   0xf   : > { %p874_p6 = scmp.ge.s32.totalorder %s1031_s26, 1  ;;  %p330_p7 = scmp.eq.s32.totalorder %s327_s14, 0 }
  0x10   : > { %p1147_p8 = por %p349_p5, %p348_p3  ;;  %p427_p9 = scmp.lt.s32.totalorder %s1031_s26, 3 }
  0x11   : > { %s1153_s16 = scalar_select %p330_p7, %s1019_s23, %s332_s30  }
  0x12   : > { %p428_p10 = pnand %p874_p6, %p427_p9 }
  0x13   : > { %p487_p11 = scmp.lt.s32.totalorder (!%p428_p10), %s1023_s24, 1  ;;  %s1332_s0 = sld [smem:[#allocation9_spill]] (!%p428_p10) }
  0x14   : > { %431 = sbr.rel (%p428_p10) target bundleno = 776 (0x308), region = 68  ;;  %s1333_s2 = sld [smem:[#allocation11_spill]] (!%p428_p10) }
  0x15   : > { %s1334_s3 = sld [smem:[#allocation12_spill]] (!%p428_p10) }
  0x16   : > { %s1336_s1 = sld [smem:[#allocation10_spill]] (!%p428_p10) }
  0x19   : > { %s1157_s17 = scalar_select %p487_p11, %s1023_s24, 1  ;;  %vm516_vm0 = vcmask 261120   ;;  %v1033_v4 = vmov 32.0   ;;  %v569_v12 = vld [vmem:[%s1318_s6 + $0x18] sm:$0xff]  ;;  %v568_v13 = vld [vmem:[%s1318_s6 + $0x10] sm:$0xff]  ;;  %v567_v15 = vld [vmem:[%s1318_s6 + $0x8] sm:$0xff] }
  0x1a   : > { %947 = vrcp.f32 %v1033_v4  ;;  %586 = vmatpush.msra.mxu0 %v569_v12  ;;  %v566_v16 = vld [vmem:[%s1318_s6] sm:$0xff]  ;;  %v641_v57 = vld [vmem:[%s1320_s8 + $0x18] sm:$0xff]  ;;  %v640_v58 = vld [vmem:[%s1320_s8 + $0x10] sm:$0xff] }
  0x1b   : > { %s1325_s18 = sshll.u32 %s1157_s17, 3  ;;  %v941_v30 = vld [vmem:[%s1333_s2] ss:$0 sm:$0xff]  ;;  %s1335_s20 = sshll.u32 %s1157_s17, 3  ;;  %662 = vmatpush.msra.mxu1 %v641_v57  ;;  %v639_v60 = vld [vmem:[%s1320_s8 + $0x8] sm:$0xff] }
  0x1c   : > { %s490_s27 = scalar_lea.vmem %s1332_s0, %s1325_s18  ;;  %587 = vmatpush.msra.mxu0 %v568_v13  ;;  %v942_v33 = vld [vmem:[%s1334_s3] ss:$0 sm:$0xff]  ;;  %s497_s18 = scalar_lea.vmem %s1336_s1, %s1335_s20  ;;  %v679_v13 = vld [vmem:[%s1322_s10 + $0x38] sm:$0xff] }
  0x1d   : > { %v515_v0 = vld [vmem:[%s490_s27] sm:$0xff]  ;;  %663 = vmatpush.msra.mxu1 %v640_v58  ;;  %s484_s27 = sand.u32 1, %s1015_s22  }
  0x1e   : > { %v517_v1 = vsel %vm516_vm0, %v515_v0, 0.0  ;;  %v528_v2 = vmul.f32 %v515_v0, %v515_v0  ;;  %588 = vmatpush.msra.mxu0 %v567_v15  ;;  %v570_v43 = vld [vmem:[%s1319_s7] sm:$0x1]  ;;  %s875_s0 = sshll.u32 %s484_s27, 3 }
  0x1f   : > { %518 = vadd.xlane.f32.xlu0 %v517_v1  ;;  %v596_v46 = vld [vmem:[%s497_s18] sm:$0xff]  ;;  %664 = vmatpush.msra.mxu1 %v639_v60  ;;  %v686_v1 = vld [vmem:[%s1322_s10 + $0x70] sm:$0xff]  ;;  %s881_s18 = sshll.u32 %s1023_s24, 3  ;;  %s486_s1 = scalar_lea.vmem [#allocation6], %s875_s0 }
  0x20   : > { %v529_v3 = vsel %vm516_vm0, %v528_v2, 0.0  ;;  %v948_v5 = vpop.eup %947  ;;  %589 = vmatpush.msra.mxu0 %v566_v16  ;;  %v638_v62 = vld [vmem:[%s1320_s8] sm:$0xff]  ;;  %v685_v2 = vld [vmem:[%s1322_s10 + $0x68] sm:$0xff]  ;;  %s734_s30 = scalar_lea.hbm %s1324_s12, %s881_s18  ;;  %s736_s20 = sshll.u32 %s486_s1, 4  ;;  %s737_s20 = int_to_ptr.vmem [resolvable:$true] %s736_s20 }
  0x21   : > { %v521_v6 = vmul.f32 32.0, %v948_v5  ;;  %vm525_vm1 = vweird.f32 %v948_v5  ;;  %665 = vmatpush.msra.mxu1 %v638_v62  ;;  %v943_v16 = vld [vmem:[%s1316_s4] ss:$0 sm:$0xff]  ;;  %s738_s2 = sshll.u32 %s734_s30, 4  ;;  %s723_s24 = scalar_lea.sflag [#allocation7], %s484_s27  ;;  %s739_s2 = int_to_ptr.hbm [resolvable:$true] %s738_s2 }
  0x22   : > { %s967_s3 = sshra.s32 %s739_s2, 4  ;;  %s973_s0 = scalar_lea.hbm %s1324_s12, 16  ;;  %s968_s3 = int_to_ptr.hbm [resolvable:$true] %s967_s3 }
  0x23   : > { %v522_v7 = vsub.f32 1.0, %v521_v6  ;;  %s969_s18 = scalar_lea.hbm %s968_s3, 8  ;;  %p974_p1 = scmp.lt.s32.totalorder %s968_s3, %s1324_s12 }
  0x24   : > { %p970_p12 = scmp.ne.s32.totalorder %s968_s3, %s969_s18  ;;  %p975_p2 = scmp.lt.s32.totalorder %s973_s0, %s969_s18 }
  0x25   : > { %v523_v8 = vmul.f32 %v948_v5, %v522_v7  ;;  %v682_v7 = vld [vmem:[%s1322_s10 + $0x50] sm:$0xff] }
  0x26   : > { %p971_p13 = pnand %p970_p12, %p1140_p4  ;;  %p976_p3 = por %p975_p2, %p974_p1 }
  0x27   : > { %530 = vadd.xlane.f32.xlu0 %v529_v3  ;;  %v524_v9 = vadd.f32 %v948_v5, %v523_v8  ;;  %v684_v3 = vld [vmem:[%s1322_s10 + $0x60] sm:$0xff] }
  0x28   : > { %p972_p0 = pneg %p971_p13 }
  0x29   : > { %v526_v11 = vsel %vm525_vm1, %v948_v5, %v524_v9  ;;  %v683_v5 = vld [vmem:[%s1322_s10 + $0x58] sm:$0xff]  ;;  %v681_v9 = vld [vmem:[%s1322_s10 + $0x48] sm:$0xff] }
  0x2a   : > { %p977_p5 = pnand %p976_p3, %p972_p0 }
  0x92   : > { %v519_v10 = vpop.xlane.xlu0 %518 }
  0x93   : > { %v527_v14 = vmul.f32 %v526_v11, %v519_v10 }
  0x95   : > { %v533_v18 = vmul.f32 %v527_v14, %v527_v14  ;;  %v536_v29 = vsub.f32 %v515_v0, %v527_v14  ;;  %v687_v0 = vld [vmem:[%s1322_s10 + $0x78] sm:$0xff] }
  0x96   : > { %688 = vmatpush.msra.mxu2 %v687_v0 }
  0x98   : > { %689 = vmatpush.msra.mxu2 %v686_v1 }
  0x9a   : > { %v531_v17 = vpop.xlane.xlu0 %530  ;;  %690 = vmatpush.msra.mxu2 %v685_v2 }
  0x9b   : > { %v532_v19 = vmul.f32 %v531_v17, %v526_v11  ;;  %v678_v17 = vld [vmem:[%s1322_s10 + $0x30] sm:$0xff] }
  0x9c   : > { %691 = vmatpush.msra.mxu2 %v684_v3 }
  0x9d   : > { %v534_v20 = vsub.f32 %v532_v19, %v533_v18  ;;  %v944_v19 = vld [vmem:[%s1317_s5] ss:$0 sm:$0xff] }
  0x9e   : > { %692 = vmatpush.msra.mxu2 %v683_v5 }
  0x9f   : > { %v535_v21 = vmax.f32 %v534_v20, 0.0 }
  0xa0   : > { %693 = vmatpush.msra.mxu2 %v682_v7 }
  0xa1   : > { %v537_v22 = vadd.f32 1e-05, %v535_v21  ;;  %v677_v21 = vld [vmem:[%s1322_s10 + $0x28] sm:$0xff] }
  0xa2   : > { %694 = vmatpush.msra.mxu2 %v681_v9 }
  0xa3   : > { %949 = vrsqrt.f32 %v537_v22  ;;  %vm544_vm3 = vweird.f32 %v537_v22 }
  0xa9   : > { %v950_v23 = vpop.eup %949 }
  0xaa   : > { %v539_v24 = vmul.f32 %v950_v23, %v537_v22  ;;  %vm545_vm2 = vweird.f32 %v950_v23 }
  0xab   : > { %vm546_vm4 = vmor %vm544_vm3, %vm545_vm2 }
  0xac   : > { %v540_v25 = vmul.f32 %v950_v23, %v539_v24 }
  0xae   : > { %v541_v26 = vmul.f32 0.5, %v540_v25  ;;  %v675_v25 = vld [vmem:[%s1322_s10 + $0x18] sm:$0xff] }
  0xb0   : > { %v542_v27 = vsub.f32 1.5, %v541_v26 }
  0xb2   : > { %v543_v28 = vmul.f32 %v950_v23, %v542_v27  ;;  %v674_v27 = vld [vmem:[%s1322_s10 + $0x10] sm:$0xff] }
  0xb4   : > { %v547_v31 = vsel %vm546_vm4, %v950_v23, %v543_v28  ;;  %v676_v23 = vld [vmem:[%s1322_s10 + $0x20] sm:$0xff]  ;;  %v673_v28 = vld [vmem:[%s1322_s10 + $0x8] sm:$0xff] }
  0xb5   : > { %v548_v32 = vmul.f32 %v547_v31, %v536_v29  ;;  %v672_v29 = vld [vmem:[%s1322_s10] sm:$0xff] }
  0xb6   : > { %v945_v31 = vld [vmem:[%s1321_s9] ss:$0 sm:$0xff] }
  0xb7   : > { %v553_v34 = vmul.f32 %v941_v30, %v548_v32  ;;  %v1034_v30 = vmov 0.0  }
  0xb8   : > { %636 = vst.msk [vmem:[#allocation5] sm:$0xff] %vm516_vm0, %v1034_v30 }
  0xb9   : > { %v558_v35 = vadd.f32 %v942_v33, %v553_v34 }
  0xbb   : > { %v559_v36 = vsel %vm516_vm0, %v558_v35, 0.0 }
  0xbc   : > { %v560_v37 = vrot.slane %v559_v36, 4 }
  0xbe   : > { %v561_v38 = vadd.f32 %v560_v37, %v559_v36 }
  0xbf   : > { %v671_v35 = vld [vmem:[#allocation5] sm:$0xff] }
  0xc0   : > { %v562_v39 = vrot.slane %v561_v38, 2 }
  0xc2   : > { %v563_v40 = vadd.f32 %v562_v39, %v561_v38  ;;  %v946_v38 = vld [vmem:[%s1323_s11] ss:$0 sm:$0xff] }
  0xc4   : > { %v564_v41 = vrot.slane %v563_v40, 1 }
  0xc6   : > { %v565_v42 = vadd.f32 %v564_v41, %v563_v40 }
  0xc8   : > { %878 = vmatmul.msk.f32.vlgmr.msra.gmra.mxu0 %vm516_vm0, %v565_v42 }
 0x145   : > { %v591_v44 = vpop.f32.mrf.mxu0 }
 0x146   : > { %v592_v45 = vadd.f32 %v591_v44, %v570_v43 }
 0x148   : > { %v597_v47 = vperm.slane %v592_v45, 0 }
 0x14a   : > { %v598_v48 = vadd.f32 %v597_v47, %v596_v46 }
 0x14c   : > { %599 = vst.msk [vmem:[#allocation3] sm:$0xff] %vm516_vm0, %v598_v48  ;;  %v600_v49 = vsel %vm516_vm0, %v598_v48, 0.0  ;;  %v604_v50 = vmul.f32 %v598_v48, %v598_v48 }
 0x14d   : > { %601 = vadd.xlane.f32.xlu1 %v600_v49 }
 0x14e   : > { %v605_v51 = vsel %vm516_vm0, %v604_v50, 0.0 }
 0x153   : > { %v713_v39 = vld [vmem:[#allocation3] sm:$0xff] }
 0x155   : > { %606 = vadd.xlane.f32.xlu1 %v605_v51 }
 0x1c0   : > { %v602_v52 = vpop.xlane.xlu1 %601 }
 0x1c1   : > { %v603_v53 = vmul.f32 %v602_v52, %v526_v11 }
 0x1c3   : > { %v609_v55 = vmul.f32 %v603_v53, %v603_v53  ;;  %v612_v15 = vsub.f32 %v598_v48, %v603_v53 }
 0x1c8   : > { %v607_v54 = vpop.xlane.xlu1 %606 }
 0x1c9   : > { %v608_v56 = vmul.f32 %v607_v54, %v526_v11  ;;  %v680_v11 = vld [vmem:[%s1322_s10 + $0x40] sm:$0xff] }
 0x1ca   : > { %695 = vmatpush.msra.mxu2 %v680_v11 }
 0x1cb   : > { %v610_v59 = vsub.f32 %v608_v56, %v609_v55 }
 0x1cc   : > { %696 = vmatpush.msra.mxu2 %v679_v13 }
 0x1cd   : > { %v611_v61 = vmax.f32 %v610_v59, 0.0 }
 0x1ce   : > { %697 = vmatpush.msra.mxu2 %v678_v17 }
 0x1cf   : > { %v613_v63 = vadd.f32 1e-05, %v611_v61 }
 0x1d0   : > { %698 = vmatpush.msra.mxu2 %v677_v21 }
 0x1d1   : > { %951 = vrsqrt.f32 %v613_v63  ;;  %vm620_vm6 = vweird.f32 %v613_v63 }
 0x1d2   : > { %699 = vmatpush.msra.mxu2 %v676_v23 }
 0x1d4   : > { %700 = vmatpush.msra.mxu2 %v675_v25 }
 0x1d6   : > { %701 = vmatpush.msra.mxu2 %v674_v27 }
 0x1d7   : > { %v952_v4 = vpop.eup %951 }
 0x1d8   : > { %v615_v6 = vmul.f32 %v952_v4, %v613_v63  ;;  %vm621_vm5 = vweird.f32 %v952_v4  ;;  %702 = vmatpush.msra.mxu2 %v673_v28 }
 0x1d9   : > { %vm622_vm7 = vmor %vm620_vm6, %vm621_vm5 }
 0x1da   : > { %v616_v8 = vmul.f32 %v952_v4, %v615_v6  ;;  %703 = vmatpush.msra.mxu2 %v672_v29 }
 0x1dc   : > { %v617_v10 = vmul.f32 0.5, %v616_v8 }
 0x1de   : > { %v618_v12 = vsub.f32 1.5, %v617_v10 }
 0x1e0   : > { %v619_v14 = vmul.f32 %v952_v4, %v618_v12 }
 0x1e2   : > { %v623_v18 = vsel %vm622_vm7, %v952_v4, %v619_v14 }
 0x1e3   : > { %v624_v20 = vmul.f32 %v623_v18, %v612_v15 }
 0x1e5   : > { %v629_v22 = vmul.f32 %v943_v16, %v624_v20 }
 0x1e7   : > { %v634_v24 = vadd.f32 %v944_v19, %v629_v22 }
 0x1e9   : > { %635 = vst.msk [vmem:[#allocation4] sm:$0xff] %vm516_vm0, %v634_v24 }
 0x1f0   : > { %v637_v26 = vld [vmem:[#allocation4] sm:$0xff] }
 0x1f1   : > { %879 = vmatmul.msk.f32.vlgmr.msra.gmra.mxu1 %vm516_vm0, %v637_v26 }
 0x26e   : > { %v667_v32 = vpop.f32.mrf.mxu1 }
 0x26f   : > { %v668_v33 = vadd.f32 %v945_v31, %v667_v32 }
 0x271   : > { %v670_v34 = vmax.f32 %v668_v33, 0.0 }
 0x273   : > { %704 = vmatmul.f32.vlgmr.msra.gmra.mxu2 %v670_v34 }
 0x2f6   : > { %v705_v36 = vpop.f32.mrf.mxu2 }
 0x2f7   : > { %v708_v37 = vadd.f32 %v705_v36, %v671_v35 }
 0x2f9   : > { %709 = vst.msk [vmem:[#allocation5] sm:$0xff] %vm516_vm0, %v708_v37 }
 0x300   : > { %v714_v40 = vld [vmem:[#allocation5] sm:$0xff] }
 0x301   : > { %v715_v41 = vadd.f32 %v714_v40, %v713_v39 }
 0x303   : > { %v720_v42 = vadd.f32 %v946_v38, %v715_v41 }
 0x305   : > { %721 = vst.msk [vmem:[%s486_s1] sm:$0xff] %vm516_vm0, %v720_v42 }
 0x306   : > { %980 = shalt.err (!%p977_p5)
}
 0x307   : > { %884 = dma.vmem_to_hbm [thread:$0]  (%p1140_p4), %s737_s20, 128, %s739_s2, %s723_s24  }
 0x308 PF: > { %p890_p6 = scmp.ge.s32.totalorder %s1031_s26, 2  ;;  %s750_s27 = sand.u32 1, %s1011_s21  }
 0x309   : > { %s751_s19 = scalar_lea.sflag [#allocation7], %s750_s27 }
 0x30a   : > { %p887_p7 = pnand %p890_p6, %p1147_p8 }
 0x30c   : > { %p888_p9 = pneg %p887_p7 }
 0x30e   : > { %1006 = dma.done.wait (%p888_p9), %s751_s19, 128  }
 0x30f   : > { %1008 = vsyncadd (%p888_p9), %s751_s19, 4294967168  ;;  %s25_s26 = sadd.s32 1, %s1031_s26   ;;  %s1337_s21 = smov %s1015_s22 }
 0x310   : > { %p22_p10 = scmp.ge.s32.totalorder %s25_s26, 4   ;;  %s1338_s22 = smov %s1019_s23 }
 0x311   : > { %s1339_s23 = smov %s1153_s16  ;;  %s1340_s24 = smov %s1027_s25 }
 0x312   : > { %s1341_s25 = smov %s1343_s29  ;;  %24 = sbr.rel (!%p22_p10) target bundleno = 9 (0x9), region = 123 }
 0x317   :  { %757 = vsyncpa [#allocation7], 1 }
 0x318   :  { %759 = vsyncpa [#allocation7 + $0x1], 1 }

</bundles_post_ra>
